<compile_context>
chip_gen: v7x
topology: tpu7x:2x2x1
jax: 0.10.0
libtpu: 0.0.40
codegen_flags: <defaults>
</compile_context>

<pallas_src>
import functools

import jax
import jax.numpy as jnp
from jax.experimental import pallas as pl
from jax.experimental.pallas import tpu as pltpu

EPS = 1e-5    # torch.nn.BatchNorm1d default
LANE = 128    # TPU lane width


def _round_up(n, m):
    return ((n + m - 1) // m) * m


def _fused_mlp_kernel(x_ref, *refs, n_layers):
    """Whole MlpNet forward in one kernel; activations stay resident in VMEM.

    refs = (w_0, b_0, w_1, b_1, ..., w_{L-1}, b_{L-1}, out)
      w_i : (Fin_i, Fout_i_p) pre-transposed, zero-padded (f32 or bf16)
      b_i : (1, Fout_i_p)     zero-padded, f32
    """
    o_ref = refs[-1]
    p = refs[:-1]

    x = x_ref[...].astype(jnp.float32)                # (N, Fin) f32
    for i in range(n_layers):                         # static unroll over layers
        w = p[2 * i][...]                             # (Fin_i, Fout_i_p)
        b = p[2 * i + 1][...]                         # (1, Fout_i_p) f32
        if i == n_layers - 1:
            # BatchNorm1d(x) -> Linear   (last projection always f32)
            mean = jnp.mean(x, axis=0, keepdims=True)
            var = jnp.maximum(
                jnp.mean(x * x, axis=0, keepdims=True) - mean * mean, 0.0)
            xn = (x - mean) * jax.lax.rsqrt(var + EPS)
            x = jnp.dot(xn.astype(w.dtype), w,
                        preferred_element_type=jnp.float32) + b
        else:
            # Linear -> Sigmoid -> BatchNorm1d
            z = jnp.dot(x.astype(w.dtype), w,
                        preferred_element_type=jnp.float32) + b
            y = 0.5 * (jnp.tanh(0.5 * z) + 1.0)       # sigmoid as one EUP op
            # E[y^2]-E[y]^2 is safe here: sigmoid-bounded activations + clamp;
            # padded columns are exactly 0.5-constant -> var 0 -> normalize to 0.
            mean = jnp.mean(y, axis=0, keepdims=True)
            var = jnp.maximum(
                jnp.mean(y * y, axis=0, keepdims=True) - mean * mean, 0.0)
            x = (y - mean) * jax.lax.rsqrt(var + EPS)
    o_ref[...] = x.astype(o_ref.dtype)


def _forward(x, flat_params, *, n_layers, out_features, out_padded):
    """Jitted forward: one pallas_call + in-executable narrowing slice."""
    n = x.shape[0]
    kernel = functools.partial(_fused_mlp_kernel, n_layers=n_layers)
    in_specs = [pl.BlockSpec(x.shape, lambda: (0, 0))] + [
        pl.BlockSpec(a.shape, lambda: (0, 0)) for a in flat_params
    ]
    out_p = pl.pallas_call(
        kernel,
        out_shape=jax.ShapeDtypeStruct((n, out_padded), jnp.float32),
        in_specs=in_specs,
        out_specs=pl.BlockSpec((n, out_padded), lambda: (0, 0)),
        compiler_params=pltpu.CompilerParams(vmem_limit_bytes=32 * 1024 * 1024),
    )(x, *flat_params)
    # Lane-dense 128-wide store in the kernel; narrow to the true width here,
    # inside the same jitted executable.
    return out_p[:, :out_features]


class MlpNetPallas:
    """Pallas/JAX port of DeepCCAModels.MlpNet (deterministic synthetic init).

    mxu_dtype=jnp.bfloat16 stores hidden-layer weights in bf16 and feeds the MXU
    bf16 operands (recommended on v6e/v7x when ~1e-3 output tolerance is OK);
    the final projection and all BN/sigmoid math remain f32.
    """

    def __init__(self, layer_sizes, input_size, key, mxu_dtype=jnp.float32):
        sizes = [input_size] + list(layer_sizes)
        self.out_features = sizes[-1]
        n_layers = len(sizes) - 1
        self.params = []   # PyTorch layout (Fout, Fin) + (Fout,), for the reference
        self.packed = []   # pre-transposed + lane-padded (Fin_p, Fout_p) / (1, Fout_p)
        for i in range(n_layers):
            key, k_w, k_b = jax.random.split(key, 3)
            fan_in = sizes[i]
            bound = fan_in ** -0.5   # nn.Linear default U(-1/sqrt(fan_in), +1/sqrt(fan_in))
            w = jax.random.uniform(k_w, (sizes[i + 1], sizes[i]), jnp.float32, -bound, bound)
            b = jax.random.uniform(k_b, (sizes[i + 1],), jnp.float32, -bound, bound)
            self.params.append((w, b))

            # Layer 0 is packed at the TRUE input width so x needs no HBM pad;
            # deeper layers match the 128-padded resident activation width.
            fin_p = sizes[i] if i == 0 else _round_up(sizes[i], LANE)
            fout_p = _round_up(sizes[i + 1], LANE)
            w_dtype = mxu_dtype if i < n_layers - 1 else jnp.float32
            w_p = (jnp.zeros((fin_p, fout_p), w_dtype)
                   .at[: sizes[i], : sizes[i + 1]].set(w.T.astype(w_dtype)))
            b_p = (jnp.zeros((1, fout_p), jnp.float32)
                   .at[0, : sizes[i + 1]].set(b))
            self.packed.append((w_p, b_p))

        self.n_layers = n_layers
        self._out_padded = _round_up(self.out_features, LANE)
        self._flat_packed = tuple(a for pair in self.packed for a in pair)
        self._forward = jax.jit(functools.partial(
            _forward,
            n_layers=self.n_layers,
            out_features=self.out_features,
            out_padded=self._out_padded))

    def __call__(self, x):
        return self._forward(x, self._flat_packed)


def _reference(x, params):
    """Pure-JAX reference matching torch training-mode semantics (f32)."""
    n_layers = len(params)
    for i, (w, b) in enumerate(params):
        if i == n_layers - 1:
            mean = jnp.mean(x, axis=0, keepdims=True)
            var = jnp.mean((x - mean) ** 2, axis=0, keepdims=True)
            x = (x - mean) / jnp.sqrt(var + EPS)
            x = x @ w.T + b
        else:
            y = jax.nn.sigmoid(x @ w.T + b)
            mean = jnp.mean(y, axis=0, keepdims=True)
            var = jnp.mean((y - mean) ** 2, axis=0, keepdims=True)
            x = (y - mean) / jnp.sqrt(var + EPS)
    return x


if __name__ == "__main__":
    key = jax.random.PRNGKey(0)
    k_in, k_params = jax.random.split(key)

    batch = 128            # >= 128 rows so the MXU systolic rows are actually fed
    input_size = 32
    layer_sizes = [32, 32, 16]   # two hidden (Linear->Sigmoid->BN) + final (BN->Linear)

    x = jax.random.normal(k_in, (batch, input_size), jnp.float32)
    ref = None

    # Reference-precision path (f32 MXU operands, all generations).
    model = MlpNetPallas(layer_sizes, input_size, k_params)
    out = jax.block_until_ready(model(x))
    ref = _reference(x, model.params)
    assert out.shape == (batch, layer_sizes[-1])
    assert jnp.allclose(out, ref, atol=1e-4, rtol=1e-4), "f32 Pallas output mismatch vs reference"

    # bf16 MXU operands for the hidden-layer dots (v6e/v7x MXU path); final
    # projection and BN/sigmoid math stay f32, so this is a looser sanity check.
    model_bf16 = MlpNetPallas(layer_sizes, input_size, k_params, mxu_dtype=jnp.bfloat16)
    out_bf16 = jax.block_until_ready(model_bf16(x))
    assert out_bf16.shape == (batch, layer_sizes[-1])
    assert jnp.allclose(out_bf16, ref, atol=5e-2, rtol=5e-2), "bf16 Pallas output mismatch vs reference"

    print("KERNEL_OK")
</pallas_src>

<mosaic_0001>
module attributes {stable_mosaic.version = 11 : i64} {
  func.func @_fused_mlp_kernel(%arg0: memref<128x32xf32, #tpu.memory_space<vmem>>, %arg1: memref<32x128xf32, #tpu.memory_space<vmem>>, %arg2: memref<1x128xf32, #tpu.memory_space<vmem>>, %arg3: memref<128x128xf32, #tpu.memory_space<vmem>>, %arg4: memref<1x128xf32, #tpu.memory_space<vmem>>, %arg5: memref<128x128xf32, #tpu.memory_space<vmem>>, %arg6: memref<1x128xf32, #tpu.memory_space<vmem>>, %arg7: memref<128x128xf32, #tpu.memory_space<vmem>>) attributes {dimension_semantics = [], scalar_prefetch = 0 : i64, scratch_operands = 0 : i64, tpu.core_type = #tpu.core_type<tc>} {
    %c0 = arith.constant 0 : index
    %c0_0 = arith.constant 0 : index
    %0 = vector.load %arg0[%c0, %c0_0] : memref<128x32xf32, #tpu.memory_space<vmem>>, vector<128x32xf32>
    %c0_1 = arith.constant 0 : index
    %c0_2 = arith.constant 0 : index
    %1 = vector.load %arg1[%c0_1, %c0_2] : memref<32x128xf32, #tpu.memory_space<vmem>>, vector<32x128xf32>
    %c0_3 = arith.constant 0 : index
    %c0_4 = arith.constant 0 : index
    %2 = vector.load %arg2[%c0_3, %c0_4] : memref<1x128xf32, #tpu.memory_space<vmem>>, vector<1x128xf32>
    %cst = arith.constant dense<0.000000e+00> : vector<128x128xf32>
    %3 = tpu.matmul %0, %1, %cst {dimension_numbers = #tpu.dot_dimension_numbers<[1], [0], [0], [1], [0, 0, 1, 1], [], []>} : vector<128x32xf32>, vector<32x128xf32>, vector<128x128xf32> -> vector<128x128xf32>
    %4 = vector.broadcast %2 : vector<1x128xf32> to vector<128x128xf32>
    %5 = arith.addf %3, %4 : vector<128x128xf32>
    %cst_5 = arith.constant 5.000000e-01 : f32
    %6 = vector.broadcast %cst_5 : f32 to vector<128x128xf32>
    %7 = arith.mulf %6, %5 : vector<128x128xf32>
    %8 = math.tanh %7 : vector<128x128xf32>
    %cst_6 = arith.constant 1.000000e+00 : f32
    %9 = vector.broadcast %cst_6 : f32 to vector<128x128xf32>
    %10 = arith.addf %8, %9 : vector<128x128xf32>
    %cst_7 = arith.constant 5.000000e-01 : f32
    %11 = vector.broadcast %cst_7 : f32 to vector<128x128xf32>
    %12 = arith.mulf %11, %10 : vector<128x128xf32>
    %cst_8 = arith.constant dense<0.000000e+00> : vector<128xf32>
    %13 = vector.multi_reduction <add>, %12, %cst_8 [0] : vector<128x128xf32> to vector<128xf32>
    %14 = vector.shape_cast %13 : vector<128xf32> to vector<1x128xf32>
    %cst_9 = arith.constant 1.280000e+02 : f32
    %15 = vector.broadcast %cst_9 : f32 to vector<1x128xf32>
    %16 = arith.divf %14, %15 : vector<1x128xf32>
    %17 = arith.mulf %12, %12 : vector<128x128xf32>
    %cst_10 = arith.constant dense<0.000000e+00> : vector<128xf32>
    %18 = vector.multi_reduction <add>, %17, %cst_10 [0] : vector<128x128xf32> to vector<128xf32>
    %19 = vector.shape_cast %18 : vector<128xf32> to vector<1x128xf32>
    %cst_11 = arith.constant 1.280000e+02 : f32
    %20 = vector.broadcast %cst_11 : f32 to vector<1x128xf32>
    %21 = arith.divf %19, %20 : vector<1x128xf32>
    %22 = arith.mulf %16, %16 : vector<1x128xf32>
    %23 = arith.subf %21, %22 : vector<1x128xf32>
    %cst_12 = arith.constant 0.000000e+00 : f32
    %24 = vector.broadcast %cst_12 : f32 to vector<1x128xf32>
    %25 = arith.maximumf %23, %24 : vector<1x128xf32>
    %26 = vector.broadcast %16 : vector<1x128xf32> to vector<128x128xf32>
    %27 = arith.subf %12, %26 : vector<128x128xf32>
    %cst_13 = arith.constant 9.99999974E-6 : f32
    %28 = vector.broadcast %cst_13 : f32 to vector<1x128xf32>
    %29 = arith.addf %25, %28 : vector<1x128xf32>
    %30 = math.rsqrt %29 : vector<1x128xf32>
    %31 = vector.broadcast %30 : vector<1x128xf32> to vector<128x128xf32>
    %32 = arith.mulf %27, %31 : vector<128x128xf32>
    %c0_14 = arith.constant 0 : index
    %c0_15 = arith.constant 0 : index
    %33 = vector.load %arg3[%c0_14, %c0_15] : memref<128x128xf32, #tpu.memory_space<vmem>>, vector<128x128xf32>
    %c0_16 = arith.constant 0 : index
    %c0_17 = arith.constant 0 : index
    %34 = vector.load %arg4[%c0_16, %c0_17] : memref<1x128xf32, #tpu.memory_space<vmem>>, vector<1x128xf32>
    %cst_18 = arith.constant dense<0.000000e+00> : vector<128x128xf32>
    %35 = tpu.matmul %32, %33, %cst_18 {dimension_numbers = #tpu.dot_dimension_numbers<[1], [0], [0], [1], [0, 0, 1, 1], [], []>} : vector<128x128xf32>, vector<128x128xf32>, vector<128x128xf32> -> vector<128x128xf32>
    %36 = vector.broadcast %34 : vector<1x128xf32> to vector<128x128xf32>
    %37 = arith.addf %35, %36 : vector<128x128xf32>
    %cst_19 = arith.constant 5.000000e-01 : f32
    %38 = vector.broadcast %cst_19 : f32 to vector<128x128xf32>
    %39 = arith.mulf %38, %37 : vector<128x128xf32>
    %40 = math.tanh %39 : vector<128x128xf32>
    %cst_20 = arith.constant 1.000000e+00 : f32
    %41 = vector.broadcast %cst_20 : f32 to vector<128x128xf32>
    %42 = arith.addf %40, %41 : vector<128x128xf32>
    %cst_21 = arith.constant 5.000000e-01 : f32
    %43 = vector.broadcast %cst_21 : f32 to vector<128x128xf32>
    %44 = arith.mulf %43, %42 : vector<128x128xf32>
    %cst_22 = arith.constant dense<0.000000e+00> : vector<128xf32>
    %45 = vector.multi_reduction <add>, %44, %cst_22 [0] : vector<128x128xf32> to vector<128xf32>
    %46 = vector.shape_cast %45 : vector<128xf32> to vector<1x128xf32>
    %cst_23 = arith.constant 1.280000e+02 : f32
    %47 = vector.broadcast %cst_23 : f32 to vector<1x128xf32>
    %48 = arith.divf %46, %47 : vector<1x128xf32>
    %49 = arith.mulf %44, %44 : vector<128x128xf32>
    %cst_24 = arith.constant dense<0.000000e+00> : vector<128xf32>
    %50 = vector.multi_reduction <add>, %49, %cst_24 [0] : vector<128x128xf32> to vector<128xf32>
    %51 = vector.shape_cast %50 : vector<128xf32> to vector<1x128xf32>
    %cst_25 = arith.constant 1.280000e+02 : f32
    %52 = vector.broadcast %cst_25 : f32 to vector<1x128xf32>
    %53 = arith.divf %51, %52 : vector<1x128xf32>
    %54 = arith.mulf %48, %48 : vector<1x128xf32>
    %55 = arith.subf %53, %54 : vector<1x128xf32>
    %cst_26 = arith.constant 0.000000e+00 : f32
    %56 = vector.broadcast %cst_26 : f32 to vector<1x128xf32>
    %57 = arith.maximumf %55, %56 : vector<1x128xf32>
    %58 = vector.broadcast %48 : vector<1x128xf32> to vector<128x128xf32>
    %59 = arith.subf %44, %58 : vector<128x128xf32>
    %cst_27 = arith.constant 9.99999974E-6 : f32
    %60 = vector.broadcast %cst_27 : f32 to vector<1x128xf32>
    %61 = arith.addf %57, %60 : vector<1x128xf32>
    %62 = math.rsqrt %61 : vector<1x128xf32>
    %63 = vector.broadcast %62 : vector<1x128xf32> to vector<128x128xf32>
    %64 = arith.mulf %59, %63 : vector<128x128xf32>
    %c0_28 = arith.constant 0 : index
    %c0_29 = arith.constant 0 : index
    %65 = vector.load %arg5[%c0_28, %c0_29] : memref<128x128xf32, #tpu.memory_space<vmem>>, vector<128x128xf32>
    %c0_30 = arith.constant 0 : index
    %c0_31 = arith.constant 0 : index
    %66 = vector.load %arg6[%c0_30, %c0_31] : memref<1x128xf32, #tpu.memory_space<vmem>>, vector<1x128xf32>
    %cst_32 = arith.constant dense<0.000000e+00> : vector<128xf32>
    %67 = vector.multi_reduction <add>, %64, %cst_32 [0] : vector<128x128xf32> to vector<128xf32>
    %68 = vector.shape_cast %67 : vector<128xf32> to vector<1x128xf32>
    %cst_33 = arith.constant 1.280000e+02 : f32
    %69 = vector.broadcast %cst_33 : f32 to vector<1x128xf32>
    %70 = arith.divf %68, %69 : vector<1x128xf32>
    %71 = arith.mulf %64, %64 : vector<128x128xf32>
    %cst_34 = arith.constant dense<0.000000e+00> : vector<128xf32>
    %72 = vector.multi_reduction <add>, %71, %cst_34 [0] : vector<128x128xf32> to vector<128xf32>
    %73 = vector.shape_cast %72 : vector<128xf32> to vector<1x128xf32>
    %cst_35 = arith.constant 1.280000e+02 : f32
    %74 = vector.broadcast %cst_35 : f32 to vector<1x128xf32>
    %75 = arith.divf %73, %74 : vector<1x128xf32>
    %76 = arith.mulf %70, %70 : vector<1x128xf32>
    %77 = arith.subf %75, %76 : vector<1x128xf32>
    %cst_36 = arith.constant 0.000000e+00 : f32
    %78 = vector.broadcast %cst_36 : f32 to vector<1x128xf32>
    %79 = arith.maximumf %77, %78 : vector<1x128xf32>
    %80 = vector.broadcast %70 : vector<1x128xf32> to vector<128x128xf32>
    %81 = arith.subf %64, %80 : vector<128x128xf32>
    %cst_37 = arith.constant 9.99999974E-6 : f32
    %82 = vector.broadcast %cst_37 : f32 to vector<1x128xf32>
    %83 = arith.addf %79, %82 : vector<1x128xf32>
    %84 = math.rsqrt %83 : vector<1x128xf32>
    %85 = vector.broadcast %84 : vector<1x128xf32> to vector<128x128xf32>
    %86 = arith.mulf %81, %85 : vector<128x128xf32>
    %cst_38 = arith.constant dense<0.000000e+00> : vector<128x128xf32>
    %87 = tpu.matmul %86, %65, %cst_38 {dimension_numbers = #tpu.dot_dimension_numbers<[1], [0], [0], [1], [0, 0, 1, 1], [], []>} : vector<128x128xf32>, vector<128x128xf32>, vector<128x128xf32> -> vector<128x128xf32>
    %88 = vector.broadcast %66 : vector<1x128xf32> to vector<128x128xf32>
    %89 = arith.addf %87, %88 : vector<128x128xf32>
    %c0_39 = arith.constant 0 : index
    %c0_40 = arith.constant 0 : index
    %90 = vector.load %arg7[%c0_39, %c0_40] : memref<128x128xf32, #tpu.memory_space<vmem>>, vector<128x128xf32>
    tpu.vector_store %arg7[%c0_39, %c0_40], %89 {strides = array<i32>} : memref<128x128xf32, #tpu.memory_space<vmem>>, vector<128x128xf32>,
    return
  }
}

</mosaic_0001>

<bundles_post_ra>
// kernel: _forward.1
= control target key start
LH: loop header
LB: loop body
LE: loop exit
PB: predicated region body
PF: predicated region fallthrough
CT: control target
= control target key end

     0   :  { %12 = vsyncpa [#allocation3], 0  ;;  %s1470_s24 = smov [#allocation2]   ;;  %s2012_s0 = inlined_call_operand.vmem [shape: f32[128,32], index: 0, kind: input, shape index: {}]   ;;  %s2013_s1 = inlined_call_operand.vmem [shape: f32[32,128], index: 1, kind: input, shape index: {}]   ;;  %s2014_s2 = inlined_call_operand.vmem [shape: f32[1,128], index: 2, kind: input, shape index: {}]   ;;  %s2015_s3 = inlined_call_operand.vmem [shape: f32[128,128], index: 3, kind: input, shape index: {}]   ;;  %s2016_s4 = inlined_call_operand.vmem [shape: f32[1,128], index: 4, kind: input, shape index: {}]   ;;  %s2017_s5 = inlined_call_operand.hbm [shape: f32[128,128], index: 5, kind: input, shape index: {}]   ;;  %s2018_s6 = inlined_call_operand.vmem [shape: f32[1,128], index: 6, kind: input, shape index: {}]   ;;  %s2019_s7 = inlined_call_operand.vmem [shape: f32[128,128], index: 7, kind: output, shape index: {}]  }
   0x1   :  { %s28_s25 = sshll.u32 %s1470_s24, 4  ;;  %s1446_s28 = scalar_lea.hbm %s2017_s5, 2048  ;;  %s29_s25 = int_to_ptr.vmem [resolvable:$true] %s28_s25 }
   0x2   :  { %p1447_p0 = scmp.ne.s32.totalorder %s2017_s5, %s1446_s28  ;;  %p1450_p1 = scmp.lt.u32.totalorder %s1446_s28, %s2017_s5 }
   0x4   :  { %p1452_p2 = pnand %p1450_p1, %p1447_p0 }
   0x6   :  { %1455 = shalt.err (!%p1452_p2)
}
   0x7   :  { %s1456_s10 = scalar_lea.vmem %s29_s25, 2048  ;;  %p1461_p4 = scmp.lt.s32.totalorder %s29_s25, %s29_s25 }
   0x8   :  { %p1457_p3 = scmp.ne.s32.totalorder %s29_s25, %s1456_s10  ;;  %p1462_p5 = scmp.lt.s32.totalorder %s1456_s10, %s1456_s10 }
   0xa   :  { %p1463_p6 = por %p1462_p5, %p1461_p4 }
   0xc   :  { %p1464_p7 = pnand %p1463_p6, %p1457_p3 }
   0xe   :  { %1467 = shalt.err (!%p1464_p7)
}
   0xf   :  { %s1471_s11 = smov 128   ;;  %s1472_s12 = smov 8  }
  0x10   :  { %34 = dma.hbm_to_vmem [thread:$0]  %s2017_s5, 2048, %s29_s25, [#allocation3], %s1471_s11, %s1471_s11, %s1472_s12  }
  0x11   :  { %1468 = dma.done.wait [#allocation3], 2048  }
  0x12   :  { %1469 = vsyncadd [#allocation3], 4294965248  ;;  %vm67_vm0 = vcmask 261120   ;;  %v56_v0 = vld [vmem:[%s2013_s1] sm:$0xff]  ;;  %v57_v1 = vld [vmem:[%s2013_s1 + $0x8] sm:$0xff] }
  0x13   :  { %v58_v2 = vld [vmem:[%s2013_s1 + $0x10] sm:$0xff]  ;;  %v1285_v3 = vpack.c.bf16 %v57_v1, %v56_v0  ;;  %v59_v4 = vld [vmem:[%s2013_s1 + $0x18] sm:$0xff]  ;;  %v40_v5 = vld [vmem:[%s2012_s0] sm:$0xff] }
  0x14   :  { %v1289_v6 = vpack.c.bf16 %v59_v4, %v58_v2  ;;  %1149 = vmatprep.mubr.msk.f32.mxu0 %vm67_vm0, %v40_v5  ;;  %v41_v7 = vld [vmem:[%s2012_s0 + $0x8] sm:$0xff]  ;;  %v42_v8 = vld [vmem:[%s2012_s0 + $0x10] sm:$0xff]  ;;  %v43_v9 = vld [vmem:[%s2012_s0 + $0x18] sm:$0xff] }
  0x15   :  { %1286 = vmatprep.subr.bf16.mxu0 %v1285_v3  ;;  %v44_v10 = vld [vmem:[%s2012_s0 + $0x20] sm:$0xff]  ;;  %v45_v11 = vld [vmem:[%s2012_s0 + $0x28] sm:$0xff]  ;;  %v46_v12 = vld [vmem:[%s2012_s0 + $0x30] sm:$0xff] }
  0x16   :  { %1288 = vmatpush3.bf16.msra.mxu0 %v1285_v3  ;;  %v47_v13 = vld [vmem:[%s2012_s0 + $0x38] sm:$0xff]  ;;  %v48_v14 = vld [vmem:[%s2012_s0 + $0x40] sm:$0xff]  ;;  %v49_v15 = vld [vmem:[%s2012_s0 + $0x48] sm:$0xff] }
  0x17   :  { %1290 = vmatprep.subr.bf16.mxu0 %v1289_v6  ;;  %v50_v16 = vld [vmem:[%s2012_s0 + $0x50] sm:$0xff]  ;;  %v51_v17 = vld [vmem:[%s2012_s0 + $0x58] sm:$0xff]  ;;  %v52_v18 = vld [vmem:[%s2012_s0 + $0x60] sm:$0xff] }
  0x18   :  { %v53_v19 = vld [vmem:[%s2012_s0 + $0x68] sm:$0xff]  ;;  %v54_v20 = vld [vmem:[%s2012_s0 + $0x70] sm:$0xff]  ;;  %v55_v21 = vld [vmem:[%s2012_s0 + $0x78] sm:$0xff] }
  0x19   :  { %v423_v22 = vld [vmem:[%s2015_s3] sm:$0xff]  ;;  %v424_v23 = vld [vmem:[%s2015_s3 + $0x8] sm:$0xff]  ;;  %v425_v25 = vld [vmem:[%s2015_s3 + $0x10] sm:$0xff] }
  0x1a   :  { %1292 = vmatpush3.bf16.msra.mxu0 %v1289_v6  ;;  %v1293_v24 = vpack.c.bf16 %v424_v23, %v423_v22  ;;  %v426_v26 = vld [vmem:[%s2015_s3 + $0x18] sm:$0xff]  ;;  %v427_v28 = vld [vmem:[%s2015_s3 + $0x20] sm:$0xff]  ;;  %v428_v29 = vld [vmem:[%s2015_s3 + $0x28] sm:$0xff] }
  0x1b   :  { %v1297_v27 = vpack.c.bf16 %v426_v26, %v425_v25  ;;  %v1301_v30 = vpack.c.bf16 %v428_v29, %v427_v28  ;;  %v429_v31 = vld [vmem:[%s2015_s3 + $0x30] sm:$0xff]  ;;  %v430_v32 = vld [vmem:[%s2015_s3 + $0x38] sm:$0xff]  ;;  %v431_v34 = vld [vmem:[%s2015_s3 + $0x40] sm:$0xff] }
  0x1c   :  { %1294 = vmatprep.subr.bf16.mxu1 %v1293_v24  ;;  %v1305_v33 = vpack.c.bf16 %v430_v32, %v429_v31  ;;  %v432_v35 = vld [vmem:[%s2015_s3 + $0x48] sm:$0xff]  ;;  %v433_v37 = vld [vmem:[%s2015_s3 + $0x50] sm:$0xff]  ;;  %v434_v38 = vld [vmem:[%s2015_s3 + $0x58] sm:$0xff] }
  0x1d   :  { %1150 = vmatmul.mubr.msk.f32.vlgmr.msra.gmra.mrb[0].mxu0 %vm67_vm0, %v41_v7  ;;  %1296 = vmatpush3.bf16.msra.mxu1 %v1293_v24  ;;  %v1309_v36 = vpack.c.bf16 %v432_v35, %v431_v34  ;;  %v1313_v39 = vpack.c.bf16 %v434_v38, %v433_v37  ;;  %v435_v40 = vld [vmem:[%s2015_s3 + $0x60] sm:$0xff]  ;;  %v436_v41 = vld [vmem:[%s2015_s3 + $0x68] sm:$0xff]  ;;  %v437_v43 = vld [vmem:[%s2015_s3 + $0x70] sm:$0xff] }
  0x1e   :  { %1152 = vmatprep.mubr.msk.f32.mxu0 %vm67_vm0, %v42_v8  ;;  %1298 = vmatprep.subr.bf16.mxu1 %v1297_v27  ;;  %v1317_v42 = vpack.c.bf16 %v436_v41, %v435_v40  ;;  %v438_v44 = vld [vmem:[%s2015_s3 + $0x78] sm:$0xff]  ;;  %v1652_v46 = vld [vmem:[%s2014_s2] ss:$0 sm:$0xff] }
  0x1f   :  { %v1321_v45 = vpack.c.bf16 %v438_v44, %v437_v43 }
  0x21   :  { %1153 = vmatmul.mubr.msk.f32.gmra.mrb[2].mxu0 %vm67_vm0, %v43_v9  ;;  %1300 = vmatpush3.bf16.msra.mxu1 %v1297_v27 }
  0x22   :  { %1155 = vmatprep.mubr.msk.f32.mxu0 %vm67_vm0, %v44_v10  ;;  %1302 = vmatprep.subr.bf16.mxu1 %v1301_v30 }
  0x25   :  { %1156 = vmatmul.mubr.msk.f32.gmra.mrb[4].mxu0 %vm67_vm0, %v45_v11  ;;  %1304 = vmatpush3.bf16.msra.mxu1 %v1301_v30 }
  0x26   :  { %1158 = vmatprep.mubr.msk.f32.mxu0 %vm67_vm0, %v46_v12  ;;  %1306 = vmatprep.subr.bf16.mxu1 %v1305_v33 }
  0x29   :  { %1159 = vmatmul.mubr.msk.f32.gmra.mrb[6].mxu0 %vm67_vm0, %v47_v13  ;;  %1308 = vmatpush3.bf16.msra.mxu1 %v1305_v33 }
  0x2a   :  { %1161 = vmatprep.mubr.msk.f32.mxu0 %vm67_vm0, %v48_v14  ;;  %1310 = vmatprep.subr.bf16.mxu1 %v1309_v36 }
  0x2d   :  { %1162 = vmatmul.mubr.msk.f32.gmra.mrb[8].mxu0 %vm67_vm0, %v49_v15  ;;  %1312 = vmatpush3.bf16.msra.mxu1 %v1309_v36 }
  0x2e   :  { %1164 = vmatprep.mubr.msk.f32.mxu0 %vm67_vm0, %v50_v16  ;;  %1314 = vmatprep.subr.bf16.mxu1 %v1313_v39 }
  0x31   :  { %1165 = vmatmul.mubr.msk.f32.gmra.mrb[10].mxu0 %vm67_vm0, %v51_v17  ;;  %1316 = vmatpush3.bf16.msra.mxu1 %v1313_v39 }
  0x32   :  { %1167 = vmatprep.mubr.msk.f32.mxu0 %vm67_vm0, %v52_v18  ;;  %1318 = vmatprep.subr.bf16.mxu1 %v1317_v42 }
  0x35   :  { %1168 = vmatmul.mubr.msk.f32.gmra.mrb[12].mxu0 %vm67_vm0, %v53_v19  ;;  %1320 = vmatpush3.bf16.msra.mxu1 %v1317_v42 }
  0x36   :  { %1170 = vmatprep.mubr.msk.f32.mxu0 %vm67_vm0, %v54_v20  ;;  %1322 = vmatprep.subr.bf16.mxu1 %v1321_v45 }
  0x39   :  { %1171 = vmatmul.mubr.msk.f32.gmra.mrb[14].mxu0 %vm67_vm0, %v55_v21  ;;  %1324 = vmatpush3.bf16.msra.mxu1 %v1321_v45 }
  0xf0   :  { %v1151_v47 = vpop.f32.mrb[0].mxu0 }
  0xf1   :  { %v188_v48 = vadd.f32 %v1151_v47, %v1652_v46  ;;  %v182_v49 = vpop.f32.mrb[1].mxu0 }
  0xf2   :  { %v183_v50 = vadd.f32 %v1652_v46, %v182_v49 }
  0xf3   :  { %v262_v51 = vmul.f32 0.5, %v188_v48 }
  0xf4   :  { %v261_v52 = vmul.f32 0.5, %v183_v50  ;;  %v1154_v53 = vpop.f32.mrb[2].mxu0 }
  0xf5   :  { %1376 = vtanh.f32 %v262_v51  ;;  %v198_v54 = vadd.f32 %v1154_v53, %v1652_v46  ;;  %v192_v55 = vpop.f32.mrb[3].mxu0 }
  0xf6   :  { %1378 = vtanh.f32 %v261_v52  ;;  %v193_v56 = vadd.f32 %v1652_v46, %v192_v55 }
  0xf7   :  { %v264_v57 = vmul.f32 0.5, %v198_v54 }
  0xf8   :  { %v263_v58 = vmul.f32 0.5, %v193_v56  ;;  %v1157_v59 = vpop.f32.mrb[4].mxu0 }
  0xf9   :  { %1380 = vtanh.f32 %v264_v57  ;;  %v208_v60 = vadd.f32 %v1157_v59, %v1652_v46  ;;  %v202_v61 = vpop.f32.mrb[5].mxu0 }
  0xfa   :  { %1382 = vtanh.f32 %v263_v58  ;;  %v203_v62 = vadd.f32 %v1652_v46, %v202_v61 }
  0xfb   :  { %v266_v63 = vmul.f32 0.5, %v208_v60 }
  0xfc   :  { %v265_v0 = vmul.f32 0.5, %v203_v62  ;;  %v1160_v1 = vpop.f32.mrb[6].mxu0 }
  0xfd   :  { %1384 = vtanh.f32 %v266_v63  ;;  %v218_v2 = vadd.f32 %v1160_v1, %v1652_v46  ;;  %v212_v3 = vpop.f32.mrb[7].mxu0 }
  0xfe   :  { %1386 = vtanh.f32 %v265_v0  ;;  %v213_v4 = vadd.f32 %v1652_v46, %v212_v3 }
  0xff   :  { %v1377_v5 = vpop.eup %1376  ;;  %v268_v6 = vmul.f32 0.5, %v218_v2 }
 0x100   :  { %v1379_v7 = vpop.eup %1378  ;;  %v294_v8 = vadd.f32 1.0, %v1377_v5  ;;  %v267_v9 = vmul.f32 0.5, %v213_v4  ;;  %v1163_v10 = vpop.f32.mrb[8].mxu0 }
 0x101   :  { %v293_v11 = vadd.f32 1.0, %v1379_v7  ;;  %1388 = vtanh.f32 %v268_v6  ;;  %v228_v12 = vadd.f32 %v1163_v10, %v1652_v46  ;;  %v222_v13 = vpop.f32.mrb[9].mxu0 }
 0x102   :  { %v1663_v14 = vmul.f32 0.5, %v294_v8  ;;  %1390 = vtanh.f32 %v267_v9  ;;  %v223_v15 = vadd.f32 %v1652_v46, %v222_v13 }
 0x103   :  { %v1381_v16 = vpop.eup %1380  ;;  %v1666_v17 = vmul.f32 0.5, %v293_v11  ;;  %v270_v18 = vmul.f32 0.5, %v228_v12 }
 0x104   :  { %v1383_v19 = vpop.eup %1382  ;;  %v349_v20 = vmul.f32 %v1663_v14, %v1663_v14  ;;  %v296_v21 = vadd.f32 1.0, %v1381_v16  ;;  %v269_v22 = vmul.f32 0.5, %v223_v15  ;;  %v1166_v23 = vpop.f32.mrb[10].mxu0 }
 0x105   :  { %v325_v24 = vadd.f32 %v1663_v14, %v1666_v17  ;;  %v348_v25 = vmul.f32 %v1666_v17, %v1666_v17  ;;  %v295_v26 = vadd.f32 1.0, %v1383_v19  ;;  %1392 = vtanh.f32 %v270_v18  ;;  %v232_v27 = vpop.f32.mrb[11].mxu0 }
 0x106   :  { %v1674_v28 = vmul.f32 0.5, %v296_v21  ;;  %1394 = vtanh.f32 %v269_v22  ;;  %v238_v29 = vadd.f32 %v1166_v23, %v1652_v46  ;;  %v233_v30 = vadd.f32 %v1652_v46, %v232_v27 }
 0x107   :  { %v1385_v31 = vpop.eup %1384  ;;  %v364_v32 = vadd.f32 %v349_v20, %v348_v25  ;;  %v1678_v33 = vmul.f32 0.5, %v295_v26 }
 0x108   :  { %v1387_v34 = vpop.eup %1386  ;;  %v298_v35 = vadd.f32 1.0, %v1385_v31  ;;  %v272_v36 = vmul.f32 0.5, %v238_v29  ;;  %v271_v37 = vmul.f32 0.5, %v233_v30  ;;  %v1169_v38 = vpop.f32.mrb[12].mxu0  ;;  %v351_v44 = vmul.f32 %v1674_v28, %v1674_v28 }
 0x109   :  { %v326_v39 = vadd.f32 %v325_v24, %v1678_v33  ;;  %v350_v40 = vmul.f32 %v1678_v33, %v1678_v33  ;;  %v297_v41 = vadd.f32 1.0, %v1387_v34  ;;  %v248_v42 = vadd.f32 %v1169_v38, %v1652_v46  ;;  %v242_v43 = vpop.f32.mrb[13].mxu0 }
 0x10a   :  { %v1686_v45 = vmul.f32 0.5, %v298_v35  ;;  %1396 = vtanh.f32 %v272_v36  ;;  %v243_v47 = vadd.f32 %v1652_v46, %v242_v43 }
 0x10b   :  { %v1389_v48 = vpop.eup %1388  ;;  %v365_v49 = vadd.f32 %v364_v32, %v350_v40  ;;  %v1689_v50 = vmul.f32 0.5, %v297_v41  ;;  %v327_v51 = vadd.f32 %v326_v39, %v1674_v28  ;;  %1398 = vtanh.f32 %v271_v37 }
 0x10c   :  { %v1391_v52 = vpop.eup %1390  ;;  %v353_v53 = vmul.f32 %v1686_v45, %v1686_v45  ;;  %v300_v54 = vadd.f32 1.0, %v1389_v48  ;;  %v274_v55 = vmul.f32 0.5, %v248_v42  ;;  %v273_v56 = vmul.f32 0.5, %v243_v47  ;;  %v1172_v57 = vpop.f32.mrb[14].mxu0 }
 0x10d   :  { %v328_v58 = vadd.f32 %v327_v51, %v1689_v50  ;;  %v352_v59 = vmul.f32 %v1689_v50, %v1689_v50  ;;  %v366_v60 = vadd.f32 %v365_v49, %v351_v44  ;;  %v299_v61 = vadd.f32 1.0, %v1391_v52  ;;  %v252_v62 = vpop.f32.mrb[15].mxu0 }
 0x10e   :  { %v1697_v63 = vmul.f32 0.5, %v300_v54  ;;  %1400 = vtanh.f32 %v274_v55  ;;  %v258_v0 = vadd.f32 %v1172_v57, %v1652_v46  ;;  %v253_v1 = vadd.f32 %v1652_v46, %v252_v62 }
 0x10f   :  { %v1393_v2 = vpop.eup %1392  ;;  %v367_v3 = vadd.f32 %v366_v60, %v352_v59  ;;  %v1701_v4 = vmul.f32 0.5, %v299_v61  ;;  %v329_v5 = vadd.f32 %v328_v58, %v1686_v45  ;;  %1402 = vtanh.f32 %v273_v56 }
 0x110   :  { %v1395_v6 = vpop.eup %1394  ;;  %v302_v7 = vadd.f32 1.0, %v1393_v2  ;;  %v276_v8 = vmul.f32 0.5, %v258_v0  ;;  %v275_v9 = vmul.f32 0.5, %v253_v1  ;;  %v355_v46 = vmul.f32 %v1697_v63, %v1697_v63 }
 0x111   :  { %v330_v10 = vadd.f32 %v329_v5, %v1701_v4  ;;  %v354_v11 = vmul.f32 %v1701_v4, %v1701_v4  ;;  %v368_v12 = vadd.f32 %v367_v3, %v353_v53  ;;  %v301_v13 = vadd.f32 1.0, %v1395_v6 }
 0x112   :  { %v1709_v15 = vmul.f32 0.5, %v302_v7  ;;  %1404 = vtanh.f32 %v276_v8 }
 0x113   :  { %v369_v16 = vadd.f32 %v368_v12, %v354_v11  ;;  %v1711_v18 = vmul.f32 0.5, %v301_v13  ;;  %v331_v19 = vadd.f32 %v330_v10, %v1697_v63  ;;  %1406 = vtanh.f32 %v275_v9 }
 0x114   :  { %v1397_v20 = vpop.eup %1396  ;;  %v357_v27 = vmul.f32 %v1709_v15, %v1709_v15 }
 0x115   :  { %v1399_v21 = vpop.eup %1398  ;;  %v332_v22 = vadd.f32 %v331_v19, %v1711_v18  ;;  %v356_v23 = vmul.f32 %v1711_v18, %v1711_v18  ;;  %v370_v24 = vadd.f32 %v369_v16, %v355_v46  ;;  %v304_v25 = vadd.f32 1.0, %v1397_v20 }
 0x116   :  { %v303_v26 = vadd.f32 1.0, %v1399_v21 }
 0x117   :  { %v371_v29 = vadd.f32 %v370_v24, %v356_v23  ;;  %v333_v30 = vadd.f32 %v332_v22, %v1709_v15  ;;  %v1720_v32 = vmul.f32 0.5, %v304_v25 }
 0x118   :  { %v1401_v31 = vpop.eup %1400  ;;  %v1722_v34 = vmul.f32 0.5, %v303_v26 }
 0x119   :  { %v1403_v35 = vpop.eup %1402  ;;  %v372_v36 = vadd.f32 %v371_v29, %v357_v27  ;;  %v306_v37 = vadd.f32 1.0, %v1401_v31  ;;  %v359_v43 = vmul.f32 %v1720_v32, %v1720_v32 }
 0x11a   :  { %v334_v38 = vadd.f32 %v333_v30, %v1722_v34  ;;  %v358_v39 = vmul.f32 %v1722_v34, %v1722_v34  ;;  %v305_v40 = vadd.f32 1.0, %v1403_v35 }
 0x11b   :  { %v1727_v41 = vmul.f32 0.5, %v306_v37 }
 0x11c   :  { %v1405_v42 = vpop.eup %1404  ;;  %v373_v44 = vadd.f32 %v372_v36, %v358_v39  ;;  %v1731_v47 = vmul.f32 0.5, %v305_v40  ;;  %v335_v48 = vadd.f32 %v334_v38, %v1720_v32 }
 0x11d   :  { %v1407_v49 = vpop.eup %1406  ;;  %v308_v51 = vadd.f32 1.0, %v1405_v42  ;;  %v361_v56 = vmul.f32 %v1727_v41, %v1727_v41 }
 0x11e   :  { %v336_v52 = vadd.f32 %v335_v48, %v1731_v47  ;;  %v360_v53 = vmul.f32 %v1731_v47, %v1731_v47  ;;  %v374_v54 = vadd.f32 %v373_v44, %v359_v43  ;;  %v307_v55 = vadd.f32 1.0, %v1407_v49 }
 0x11f   :  { %v1739_v58 = vmul.f32 0.5, %v308_v51 }
 0x120   :  { %v375_v57 = vadd.f32 %v374_v54, %v360_v53  ;;  %v323_v59 = vmul.f32 0.5, %v307_v55  ;;  %v337_v60 = vadd.f32 %v336_v52, %v1727_v41  ;;  %v752_v55 = vld [vmem:[#allocation2] sm:$0xff] }
 0x121   :  { %v363_v1 = vmul.f32 %v1739_v58, %v1739_v58 }
 0x122   :  { %v338_v61 = vadd.f32 %v337_v60, %v323_v59  ;;  %v362_v62 = vmul.f32 %v323_v59, %v323_v59  ;;  %v376_v0 = vadd.f32 %v375_v57, %v361_v56  ;;  %v753_v56 = vld [vmem:[#allocation2 + $0x8] sm:$0xff]  ;;  %v754_v57 = vld [vmem:[#allocation2 + $0x10] sm:$0xff] }
 0x124   :  { %v339_v2 = vadd.f32 %v338_v61, %v1739_v58  ;;  %v377_v3 = vadd.f32 %v376_v0, %v362_v62  ;;  %v756_v61 = vld [vmem:[#allocation2 + $0x20] sm:$0xff]  ;;  %v757_v62 = vld [vmem:[#allocation2 + $0x28] sm:$0xff] }
 0x125   :  { %v1333_v0 = vpack.c.bf16 %v757_v62, %v756_v61 }
 0x126   :  { %v340_v5 = vrot.slane %v339_v2, 4  ;;  %v378_v6 = vadd.f32 %v377_v3, %v363_v1  ;;  %v758_v1 = vld [vmem:[#allocation2 + $0x30] sm:$0xff] }
 0x128   :  { %v341_v7 = vadd.f32 %v340_v5, %v339_v2  ;;  %v379_v8 = vrot.slane %v378_v6, 4  ;;  %v759_v2 = vld [vmem:[#allocation2 + $0x38] sm:$0xff]  ;;  %v760_v5 = vld [vmem:[#allocation2 + $0x40] sm:$0xff] }
 0x129   :  { %v1337_v3 = vpack.c.bf16 %v759_v2, %v758_v1 }
 0x12a   :  { %v342_v9 = vrot.slane %v341_v7, 2  ;;  %v380_v10 = vadd.f32 %v379_v8, %v378_v6  ;;  %v761_v6 = vld [vmem:[#allocation2 + $0x48] sm:$0xff]  ;;  %v762_v8 = vld [vmem:[#allocation2 + $0x50] sm:$0xff] }
 0x12c   :  { %v343_v11 = vadd.f32 %v342_v9, %v341_v7  ;;  %v381_v12 = vrot.slane %v380_v10, 2  ;;  %v1341_v7 = vpack.c.bf16 %v761_v6, %v760_v5  ;;  %v763_v9 = vld [vmem:[#allocation2 + $0x58] sm:$0xff] }
 0x12e   :  { %v344_v13 = vrot.slane %v343_v11, 1  ;;  %v382_v46 = vadd.f32 %v381_v12, %v380_v10  ;;  %v1345_v10 = vpack.c.bf16 %v763_v9, %v762_v8  ;;  %v765_v12 = vld [vmem:[#allocation2 + $0x68] sm:$0xff] }
 0x130   :  { %v345_v16 = vadd.f32 %v344_v13, %v343_v11  ;;  %v383_v19 = vrot.slane %v382_v46, 1  ;;  %v764_v11 = vld [vmem:[#allocation2 + $0x60] sm:$0xff] }
 0x131   :  { %v1349_v13 = vpack.c.bf16 %v765_v12, %v764_v11 }
 0x132   :  { %v347_v20 = vmul.f32 0.0078125, %v345_v16  ;;  %v384_v21 = vadd.f32 %v383_v19, %v382_v46  ;;  %v766_v46 = vld [vmem:[#allocation2 + $0x70] sm:$0xff]  ;;  %v767_v16 = vld [vmem:[#allocation2 + $0x78] sm:$0xff] }
 0x133   :  { %v1353_v19 = vpack.c.bf16 %v767_v16, %v766_v46 }
 0x134   :  { %v385_v22 = vmul.f32 0.0078125, %v384_v21  ;;  %v386_v23 = vmul.f32 %v347_v20, %v347_v20  ;;  %v389_v24 = vsub.f32 %v1666_v17, %v347_v20  ;;  %v390_v25 = vsub.f32 %v1663_v14, %v347_v20 }
 0x135   :  { %v391_v26 = vsub.f32 %v1678_v33, %v347_v20  ;;  %v392_v27 = vsub.f32 %v1674_v28, %v347_v20  ;;  %v393_v29 = vsub.f32 %v1689_v50, %v347_v20  ;;  %v394_v30 = vsub.f32 %v1686_v45, %v347_v20 }
 0x136   :  { %v387_v31 = vsub.f32 %v385_v22, %v386_v23  ;;  %v395_v35 = vsub.f32 %v1701_v4, %v347_v20  ;;  %v396_v36 = vsub.f32 %v1697_v63, %v347_v20  ;;  %v397_v37 = vsub.f32 %v1711_v18, %v347_v20 }
 0x137   :  { %v398_v38 = vsub.f32 %v1709_v15, %v347_v20  ;;  %v399_v17 = vsub.f32 %v1722_v34, %v347_v20  ;;  %v400_v14 = vsub.f32 %v1720_v32, %v347_v20  ;;  %v401_v33 = vsub.f32 %v1731_v47, %v347_v20 }
 0x138   :  { %v388_v28 = vmax.f32 %v387_v31, 0.0  ;;  %v402_v50 = vsub.f32 %v1727_v41, %v347_v20  ;;  %v403_v39 = vsub.f32 %v323_v59, %v347_v20  ;;  %v404_v45 = vsub.f32 %v1739_v58, %v347_v20  ;;  %v755_v59 = vld [vmem:[#allocation2 + $0x18] sm:$0xff]  ;;  %v1763_v20 = vld [vmem:[%s2016_s4] ss:$0 sm:$0xff] }
 0x139   :  { %v1325_v58 = vpack.c.bf16 %v753_v56, %v752_v55  ;;  %v1329_v60 = vpack.c.bf16 %v755_v59, %v754_v57 }
 0x13a   :  { %v405_v40 = vadd.f32 1e-05, %v388_v28 }
 0x13b   :  { %1326 = vmatprep.subr.bf16.mxu0 %v1325_v58  ;;  %1357 = vmatprep.subr.bf16.mxu1 %v1325_v58 }
 0x13c   :  { %1408 = vrsqrt.f32 %v405_v40  ;;  %1328 = vmatpush3.bf16.msra.mxu0 %v1325_v58 }
 0x13d   :  { %1330 = vmatprep.subr.bf16.mxu0 %v1329_v60 }
 0x140   :  { %1332 = vmatpush3.bf16.msra.mxu0 %v1329_v60 }
 0x141   :  { %1334 = vmatprep.subr.bf16.mxu0 %v1333_v0 }
 0x144   :  { %1336 = vmatpush3.bf16.msra.mxu0 %v1333_v0 }
 0x145   :  { %1338 = vmatprep.subr.bf16.mxu0 %v1337_v3 }
 0x146   :  { %v1409_v4 = vpop.eup %1408 }
 0x147   :  { %v407_v63 = vmul.f32 %v1409_v4, %v389_v24  ;;  %v408_v42 = vmul.f32 %v1409_v4, %v390_v25  ;;  %v409_v18 = vmul.f32 %v1409_v4, %v391_v26  ;;  %v410_v43 = vmul.f32 %v1409_v4, %v392_v27 }
 0x148   :  { %v411_v15 = vmul.f32 %v1409_v4, %v393_v29  ;;  %v412_v44 = vmul.f32 %v1409_v4, %v394_v30  ;;  %v413_v34 = vmul.f32 %v1409_v4, %v395_v35  ;;  %v414_v48 = vmul.f32 %v1409_v4, %v396_v36  ;;  %1340 = vmatpush3.bf16.msra.mxu0 %v1337_v3 }
 0x149   :  { %1205 = vmatprep.mubr.f32.mxu1 %v407_v63  ;;  %v415_v32 = vmul.f32 %v1409_v4, %v397_v37  ;;  %v416_v47 = vmul.f32 %v1409_v4, %v398_v38  ;;  %v417_v49 = vmul.f32 %v1409_v4, %v399_v17  ;;  %v418_v51 = vmul.f32 %v1409_v4, %v400_v14 }
 0x14a   :  { %1206 = vmatmul.mubr.f32.vlgmr.msra.gmra.mrb[0].mxu1 %v408_v42  ;;  %v419_v41 = vmul.f32 %v1409_v4, %v401_v33  ;;  %v420_v52 = vmul.f32 %v1409_v4, %v402_v50  ;;  %v421_v53 = vmul.f32 %v1409_v4, %v403_v39  ;;  %v422_v54 = vmul.f32 %v1409_v4, %v404_v45 }
 0x14b   :  { %1208 = vmatprep.mubr.f32.mxu1 %v409_v18  ;;  %1365 = vmatpush3.bf16.msra.mxu1 %v1325_v58 }
 0x14c   :  { %1358 = vmatprep.subr.bf16.mxu1 %v1329_v60  ;;  %1342 = vmatprep.subr.bf16.mxu0 %v1341_v7 }
 0x14d   :  { %1344 = vmatpush3.bf16.msra.mxu0 %v1341_v7 }
 0x14e   :  { %1209 = vmatmul.mubr.f32.gmra.mrb[2].mxu1 %v410_v43  ;;  %1346 = vmatprep.subr.bf16.mxu0 %v1345_v10 }
 0x14f   :  { %1211 = vmatprep.mubr.f32.mxu1 %v411_v15  ;;  %1366 = vmatpush3.bf16.msra.mxu1 %v1329_v60 }
 0x150   :  { %1359 = vmatprep.subr.bf16.mxu1 %v1333_v0 }
 0x151   :  { %1348 = vmatpush3.bf16.msra.mxu0 %v1345_v10 }
 0x152   :  { %1212 = vmatmul.mubr.f32.gmra.mrb[4].mxu1 %v412_v44  ;;  %1350 = vmatprep.subr.bf16.mxu0 %v1349_v13 }
 0x153   :  { %1214 = vmatprep.mubr.f32.mxu1 %v413_v34  ;;  %1367 = vmatpush3.bf16.msra.mxu1 %v1333_v0 }
 0x154   :  { %1360 = vmatprep.subr.bf16.mxu1 %v1337_v3 }
 0x155   :  { %1352 = vmatpush3.bf16.msra.mxu0 %v1349_v13 }
 0x156   :  { %1215 = vmatmul.mubr.f32.gmra.mrb[6].mxu1 %v414_v48  ;;  %1354 = vmatprep.subr.bf16.mxu0 %v1353_v19 }
 0x157   :  { %1217 = vmatprep.mubr.f32.mxu1 %v415_v32  ;;  %1368 = vmatpush3.bf16.msra.mxu1 %v1337_v3 }
 0x158   :  { %1361 = vmatprep.subr.bf16.mxu1 %v1341_v7 }
 0x159   :  { %1356 = vmatpush3.bf16.msra.mxu0 %v1353_v19 }
 0x15a   :  { %1218 = vmatmul.mubr.f32.gmra.mrb[8].mxu1 %v416_v47 }
 0x15b   :  { %1220 = vmatprep.mubr.f32.mxu1 %v417_v49  ;;  %1369 = vmatpush3.bf16.msra.mxu1 %v1341_v7 }
 0x15c   :  { %1362 = vmatprep.subr.bf16.mxu1 %v1345_v10 }
 0x15e   :  { %1221 = vmatmul.mubr.f32.gmra.mrb[10].mxu1 %v418_v51 }
 0x15f   :  { %1223 = vmatprep.mubr.f32.mxu1 %v419_v41  ;;  %1370 = vmatpush3.bf16.msra.mxu1 %v1345_v10 }
 0x160   :  { %1363 = vmatprep.subr.bf16.mxu1 %v1349_v13 }
 0x162   :  { %1224 = vmatmul.mubr.f32.gmra.mrb[12].mxu1 %v420_v52 }
 0x163   :  { %1226 = vmatprep.mubr.f32.mxu1 %v421_v53  ;;  %1371 = vmatpush3.bf16.msra.mxu1 %v1349_v13 }
 0x164   :  { %1364 = vmatprep.subr.bf16.mxu1 %v1353_v19 }
 0x166   :  { %1227 = vmatmul.mubr.f32.gmra.mrb[14].mxu1 %v422_v54 }
 0x167   :  { %1372 = vmatpush3.bf16.msra.mxu1 %v1353_v19 }
 0x21d   :  { %v1207_v21 = vpop.f32.mrb[0].mxu1 }
 0x21e   :  { %v518_v22 = vadd.f32 %v1207_v21, %v1763_v20  ;;  %v512_v23 = vpop.f32.mrb[1].mxu1 }
 0x21f   :  { %v513_v24 = vadd.f32 %v1763_v20, %v512_v23 }
 0x220   :  { %v592_v25 = vmul.f32 0.5, %v518_v22 }
 0x221   :  { %v591_v26 = vmul.f32 0.5, %v513_v24  ;;  %v1210_v27 = vpop.f32.mrb[2].mxu1 }
 0x222   :  { %1410 = vtanh.f32 %v592_v25  ;;  %v528_v29 = vadd.f32 %v1210_v27, %v1763_v20  ;;  %v522_v30 = vpop.f32.mrb[3].mxu1 }
 0x223   :  { %1412 = vtanh.f32 %v591_v26  ;;  %v523_v31 = vadd.f32 %v1763_v20, %v522_v30 }
 0x224   :  { %v594_v35 = vmul.f32 0.5, %v528_v29 }
 0x225   :  { %v593_v36 = vmul.f32 0.5, %v523_v31  ;;  %v1213_v37 = vpop.f32.mrb[4].mxu1 }
 0x226   :  { %1414 = vtanh.f32 %v594_v35  ;;  %v538_v38 = vadd.f32 %v1213_v37, %v1763_v20  ;;  %v532_v17 = vpop.f32.mrb[5].mxu1 }
 0x227   :  { %1416 = vtanh.f32 %v593_v36  ;;  %v533_v14 = vadd.f32 %v1763_v20, %v532_v17 }
 0x228   :  { %v596_v33 = vmul.f32 0.5, %v538_v38 }
 0x229   :  { %v595_v28 = vmul.f32 0.5, %v533_v14  ;;  %v1216_v50 = vpop.f32.mrb[6].mxu1 }
 0x22a   :  { %1418 = vtanh.f32 %v596_v33  ;;  %v548_v39 = vadd.f32 %v1216_v50, %v1763_v20  ;;  %v542_v45 = vpop.f32.mrb[7].mxu1 }
 0x22b   :  { %1420 = vtanh.f32 %v595_v28  ;;  %v543_v40 = vadd.f32 %v1763_v20, %v542_v45 }
 0x22c   :  { %v1411_v4 = vpop.eup %1410  ;;  %v598_v63 = vmul.f32 0.5, %v548_v39 }
 0x22d   :  { %v1413_v42 = vpop.eup %1412  ;;  %v624_v18 = vadd.f32 1.0, %v1411_v4  ;;  %v597_v43 = vmul.f32 0.5, %v543_v40  ;;  %v1219_v15 = vpop.f32.mrb[8].mxu1 }
 0x22e   :  { %v623_v44 = vadd.f32 1.0, %v1413_v42  ;;  %1422 = vtanh.f32 %v598_v63  ;;  %v558_v34 = vadd.f32 %v1219_v15, %v1763_v20  ;;  %v552_v48 = vpop.f32.mrb[9].mxu1 }
 0x22f   :  { %v1774_v32 = vmul.f32 0.5, %v624_v18  ;;  %1424 = vtanh.f32 %v597_v43  ;;  %v553_v47 = vadd.f32 %v1763_v20, %v552_v48 }
 0x230   :  { %v1415_v49 = vpop.eup %1414  ;;  %v1777_v51 = vmul.f32 0.5, %v623_v44  ;;  %v600_v41 = vmul.f32 0.5, %v558_v34 }
 0x231   :  { %v1417_v52 = vpop.eup %1416  ;;  %v678_v53 = vmul.f32 %v1774_v32, %v1774_v32  ;;  %v626_v54 = vadd.f32 1.0, %v1415_v49  ;;  %v599_v55 = vmul.f32 0.5, %v553_v47  ;;  %v1222_v56 = vpop.f32.mrb[10].mxu1 }
 0x232   :  { %v655_v57 = vadd.f32 %v1774_v32, %v1777_v51  ;;  %v677_v58 = vmul.f32 %v1777_v51, %v1777_v51  ;;  %v625_v59 = vadd.f32 1.0, %v1417_v52  ;;  %1426 = vtanh.f32 %v600_v41  ;;  %v562_v60 = vpop.f32.mrb[11].mxu1 }
 0x233   :  { %v1785_v61 = vmul.f32 0.5, %v626_v54  ;;  %1428 = vtanh.f32 %v599_v55  ;;  %v568_v62 = vadd.f32 %v1222_v56, %v1763_v20  ;;  %v563_v0 = vadd.f32 %v1763_v20, %v562_v60 }
 0x234   :  { %v1419_v1 = vpop.eup %1418  ;;  %v693_v2 = vadd.f32 %v678_v53, %v677_v58  ;;  %v1789_v3 = vmul.f32 0.5, %v625_v59 }
 0x235   :  { %v1421_v5 = vpop.eup %1420  ;;  %v628_v6 = vadd.f32 1.0, %v1419_v1  ;;  %v602_v7 = vmul.f32 0.5, %v568_v62  ;;  %v601_v8 = vmul.f32 0.5, %v563_v0  ;;  %v1225_v9 = vpop.f32.mrb[12].mxu1  ;;  %v680_v16 = vmul.f32 %v1785_v61, %v1785_v61 }
 0x236   :  { %v656_v10 = vadd.f32 %v655_v57, %v1789_v3  ;;  %v679_v11 = vmul.f32 %v1789_v3, %v1789_v3  ;;  %v627_v12 = vadd.f32 1.0, %v1421_v5  ;;  %v578_v13 = vadd.f32 %v1225_v9, %v1763_v20  ;;  %v572_v46 = vpop.f32.mrb[13].mxu1 }
 0x237   :  { %v1797_v19 = vmul.f32 0.5, %v628_v6  ;;  %1430 = vtanh.f32 %v602_v7  ;;  %v573_v21 = vadd.f32 %v1763_v20, %v572_v46 }
 0x238   :  { %v1423_v22 = vpop.eup %1422  ;;  %v694_v23 = vadd.f32 %v693_v2, %v679_v11  ;;  %v1800_v24 = vmul.f32 0.5, %v627_v12  ;;  %v657_v25 = vadd.f32 %v656_v10, %v1785_v61  ;;  %1432 = vtanh.f32 %v601_v8 }
 0x239   :  { %v1425_v26 = vpop.eup %1424  ;;  %v682_v27 = vmul.f32 %v1797_v19, %v1797_v19  ;;  %v630_v29 = vadd.f32 1.0, %v1423_v22  ;;  %v604_v30 = vmul.f32 0.5, %v578_v13  ;;  %v603_v31 = vmul.f32 0.5, %v573_v21  ;;  %v1228_v35 = vpop.f32.mrb[14].mxu1 }
 0x23a   :  { %v658_v36 = vadd.f32 %v657_v25, %v1800_v24  ;;  %v681_v37 = vmul.f32 %v1800_v24, %v1800_v24  ;;  %v695_v38 = vadd.f32 %v694_v23, %v680_v16  ;;  %v629_v17 = vadd.f32 1.0, %v1425_v26  ;;  %v582_v14 = vpop.f32.mrb[15].mxu1 }
 0x23b   :  { %v1808_v33 = vmul.f32 0.5, %v630_v29  ;;  %1434 = vtanh.f32 %v604_v30  ;;  %v588_v28 = vadd.f32 %v1228_v35, %v1763_v20  ;;  %v583_v50 = vadd.f32 %v1763_v20, %v582_v14 }
 0x23c   :  { %v1427_v39 = vpop.eup %1426  ;;  %v696_v45 = vadd.f32 %v695_v38, %v681_v37  ;;  %v1812_v40 = vmul.f32 0.5, %v629_v17  ;;  %v659_v4 = vadd.f32 %v658_v36, %v1797_v19  ;;  %1436 = vtanh.f32 %v603_v31 }
 0x23d   :  { %v1429_v63 = vpop.eup %1428  ;;  %v632_v42 = vadd.f32 1.0, %v1427_v39  ;;  %v606_v18 = vmul.f32 0.5, %v588_v28  ;;  %v605_v43 = vmul.f32 0.5, %v583_v50  ;;  %v684_v20 = vmul.f32 %v1808_v33, %v1808_v33 }
 0x23e   :  { %v660_v15 = vadd.f32 %v659_v4, %v1812_v40  ;;  %v683_v44 = vmul.f32 %v1812_v40, %v1812_v40  ;;  %v697_v34 = vadd.f32 %v696_v45, %v682_v27  ;;  %v631_v48 = vadd.f32 1.0, %v1429_v63 }
 0x23f   :  { %v1820_v47 = vmul.f32 0.5, %v632_v42  ;;  %1438 = vtanh.f32 %v606_v18 }
 0x240   :  { %v698_v49 = vadd.f32 %v697_v34, %v683_v44  ;;  %v1822_v41 = vmul.f32 0.5, %v631_v48  ;;  %v661_v52 = vadd.f32 %v660_v15, %v1808_v33  ;;  %1440 = vtanh.f32 %v605_v43 }
 0x241   :  { %v1431_v53 = vpop.eup %1430  ;;  %v686_v60 = vmul.f32 %v1820_v47, %v1820_v47 }
 0x242   :  { %v1433_v54 = vpop.eup %1432  ;;  %v662_v55 = vadd.f32 %v661_v52, %v1822_v41  ;;  %v685_v56 = vmul.f32 %v1822_v41, %v1822_v41  ;;  %v699_v57 = vadd.f32 %v698_v49, %v684_v20  ;;  %v634_v58 = vadd.f32 1.0, %v1431_v53 }
 0x243   :  { %v633_v59 = vadd.f32 1.0, %v1433_v54 }
 0x244   :  { %v700_v62 = vadd.f32 %v699_v57, %v685_v56  ;;  %v663_v0 = vadd.f32 %v662_v55, %v1820_v47  ;;  %v1831_v2 = vmul.f32 0.5, %v634_v58 }
 0x245   :  { %v1435_v1 = vpop.eup %1434  ;;  %v1833_v5 = vmul.f32 0.5, %v633_v59 }
 0x246   :  { %v1437_v6 = vpop.eup %1436  ;;  %v701_v7 = vadd.f32 %v700_v62, %v686_v60  ;;  %v636_v8 = vadd.f32 1.0, %v1435_v1  ;;  %v688_v46 = vmul.f32 %v1831_v2, %v1831_v2 }
 0x247   :  { %v664_v9 = vadd.f32 %v663_v0, %v1833_v5  ;;  %v687_v10 = vmul.f32 %v1833_v5, %v1833_v5  ;;  %v635_v11 = vadd.f32 1.0, %v1437_v6 }
 0x248   :  { %v1838_v12 = vmul.f32 0.5, %v636_v8 }
 0x249   :  { %v1439_v13 = vpop.eup %1438  ;;  %v702_v16 = vadd.f32 %v701_v7, %v687_v10  ;;  %v1842_v21 = vmul.f32 0.5, %v635_v11  ;;  %v665_v22 = vadd.f32 %v664_v9, %v1831_v2 }
 0x24a   :  { %v1441_v23 = vpop.eup %1440  ;;  %v638_v25 = vadd.f32 1.0, %v1439_v13  ;;  %v690_v31 = vmul.f32 %v1838_v12, %v1838_v12 }
 0x24b   :  { %v666_v26 = vadd.f32 %v665_v22, %v1842_v21  ;;  %v689_v27 = vmul.f32 %v1842_v21, %v1842_v21  ;;  %v703_v29 = vadd.f32 %v702_v16, %v688_v46  ;;  %v637_v30 = vadd.f32 1.0, %v1441_v23 }
 0x24c   :  { %v654_v36 = vmul.f32 0.5, %v638_v25 }
 0x24d   :  { %v704_v35 = vadd.f32 %v703_v29, %v689_v27  ;;  %v653_v37 = vmul.f32 0.5, %v637_v30  ;;  %v667_v38 = vadd.f32 %v666_v26, %v1838_v12 }
 0x24e   :  { %v692_v50 = vmul.f32 %v654_v36, %v654_v36 }
 0x24f   :  { %v668_v17 = vadd.f32 %v667_v38, %v653_v37  ;;  %v691_v14 = vmul.f32 %v653_v37, %v653_v37  ;;  %v705_v28 = vadd.f32 %v704_v35, %v690_v31 }
 0x251   :  { %v669_v39 = vadd.f32 %v668_v17, %v654_v36  ;;  %v706_v45 = vadd.f32 %v705_v28, %v691_v14 }
 0x253   :  { %v670_v4 = vrot.slane %v669_v39, 4  ;;  %v707_v63 = vadd.f32 %v706_v45, %v692_v50 }
 0x255   :  { %v671_v42 = vadd.f32 %v670_v4, %v669_v39  ;;  %v708_v18 = vrot.slane %v707_v63, 4 }
 0x257   :  { %v672_v43 = vrot.slane %v671_v42, 2  ;;  %v709_v15 = vadd.f32 %v708_v18, %v707_v63 }
 0x259   :  { %v673_v44 = vadd.f32 %v672_v43, %v671_v42  ;;  %v710_v34 = vrot.slane %v709_v15, 2 }
 0x25b   :  { %v674_v48 = vrot.slane %v673_v44, 1  ;;  %v711_v20 = vadd.f32 %v710_v34, %v709_v15 }
 0x25d   :  { %v675_v49 = vadd.f32 %v674_v48, %v673_v44  ;;  %v712_v52 = vrot.slane %v711_v20, 1 }
 0x25f   :  { %v676_v53 = vmul.f32 0.0078125, %v675_v49  ;;  %v713_v54 = vadd.f32 %v712_v52, %v711_v20 }
 0x261   :  { %v714_v55 = vmul.f32 0.0078125, %v713_v54  ;;  %v715_v56 = vmul.f32 %v676_v53, %v676_v53  ;;  %v732_v57 = vsub.f32 %v653_v37, %v676_v53  ;;  %v718_v58 = vsub.f32 %v1777_v51, %v676_v53 }
 0x262   :  { %v719_v59 = vsub.f32 %v1774_v32, %v676_v53  ;;  %v720_v60 = vsub.f32 %v1789_v3, %v676_v53  ;;  %v721_v62 = vsub.f32 %v1785_v61, %v676_v53  ;;  %v722_v0 = vsub.f32 %v1800_v24, %v676_v53 }
 0x263   :  { %v716_v1 = vsub.f32 %v714_v55, %v715_v56  ;;  %v723_v6 = vsub.f32 %v1797_v19, %v676_v53  ;;  %v724_v7 = vsub.f32 %v1812_v40, %v676_v53  ;;  %v725_v8 = vsub.f32 %v1808_v33, %v676_v53 }
 0x264   :  { %v726_v9 = vsub.f32 %v1822_v41, %v676_v53  ;;  %v727_v10 = vsub.f32 %v1820_v47, %v676_v53  ;;  %v728_v51 = vsub.f32 %v1833_v5, %v676_v53  ;;  %v729_v32 = vsub.f32 %v1831_v2, %v676_v53 }
 0x265   :  { %v717_v3 = vmax.f32 %v716_v1, 0.0  ;;  %v730_v61 = vsub.f32 %v1842_v21, %v676_v53  ;;  %v731_v24 = vsub.f32 %v1838_v12, %v676_v53  ;;  %v733_v11 = vsub.f32 %v654_v36, %v676_v53 }
 0x267   :  { %v734_v13 = vadd.f32 1e-05, %v717_v3 }
 0x269   :  { %1442 = vrsqrt.f32 %v734_v13 }
 0x273   :  { %v1443_v19 = vpop.eup %1442 }
 0x274   :  { %v1865_v40 = vmul.f32 %v1443_v19, %v732_v57  ;;  %v1867_v33 = vmul.f32 %v1443_v19, %v718_v58  ;;  %v1869_v41 = vmul.f32 %v1443_v19, %v719_v59  ;;  %v1871_v47 = vmul.f32 %v1443_v19, %v720_v60 }
 0x275   :  { %v1873_v5 = vmul.f32 %v1443_v19, %v721_v62  ;;  %v1875_v2 = vmul.f32 %v1443_v19, %v722_v0  ;;  %v1877_v46 = vmul.f32 %v1443_v19, %v723_v6  ;;  %v1879_v16 = vmul.f32 %v1443_v19, %v724_v7 }
 0x276   :  { %v1881_v12 = vmul.f32 %v1443_v19, %v725_v8  ;;  %v1883_v21 = vmul.f32 %v1443_v19, %v726_v9  ;;  %v1885_v22 = vmul.f32 %v1443_v19, %v727_v10  ;;  %v1887_v23 = vmul.f32 %v1443_v19, %v728_v51 }
 0x277   :  { %v1889_v25 = vmul.f32 %v1443_v19, %v729_v32  ;;  %v1891_v26 = vmul.f32 %v1443_v19, %v730_v61  ;;  %v1893_v27 = vmul.f32 %v1443_v19, %v731_v24  ;;  %v1895_v29 = vmul.f32 %v1443_v19, %v733_v11 }
 0x278   :  { %v769_v30 = vadd.f32 %v1869_v41, %v1867_v33  ;;  %v791_v31 = vmul.f32 %v1867_v33, %v1867_v33  ;;  %v792_v35 = vmul.f32 %v1869_v41, %v1869_v41  ;;  %v793_v38 = vmul.f32 %v1871_v47, %v1871_v47 }
 0x279   :  { %v794_v28 = vmul.f32 %v1873_v5, %v1873_v5  ;;  %v795_v45 = vmul.f32 %v1875_v2, %v1875_v2  ;;  %v796_v42 = vmul.f32 %v1877_v46, %v1877_v46  ;;  %v797_v15 = vmul.f32 %v1879_v16, %v1879_v16 }
 0x27a   :  { %v770_v36 = vadd.f32 %v769_v30, %v1871_v47  ;;  %v807_v17 = vadd.f32 %v792_v35, %v791_v31  ;;  %v798_v48 = vmul.f32 %v1881_v12, %v1881_v12  ;;  %v799_v52 = vmul.f32 %v1883_v21, %v1883_v21 }
 0x27b   :  { %v800_v55 = vmul.f32 %v1885_v22, %v1885_v22  ;;  %v801_v58 = vmul.f32 %v1887_v23, %v1887_v23  ;;  %v802_v62 = vmul.f32 %v1889_v25, %v1889_v25  ;;  %v803_v6 = vmul.f32 %v1891_v26, %v1891_v26 }
 0x27c   :  { %v771_v37 = vadd.f32 %v770_v36, %v1873_v5  ;;  %v808_v50 = vadd.f32 %v807_v17, %v793_v38  ;;  %v804_v9 = vmul.f32 %v1893_v27, %v1893_v27  ;;  %v805_v51 = vmul.f32 %v1865_v40, %v1865_v40 }
 0x27d   :  { %v806_v24 = vmul.f32 %v1895_v29, %v1895_v29 }
 0x27e   :  { %v772_v14 = vadd.f32 %v771_v37, %v1875_v2  ;;  %v809_v4 = vadd.f32 %v808_v50, %v794_v28 }
 0x280   :  { %v773_v39 = vadd.f32 %v772_v14, %v1877_v46  ;;  %v810_v18 = vadd.f32 %v809_v4, %v795_v45 }
 0x282   :  { %v774_v63 = vadd.f32 %v773_v39, %v1879_v16  ;;  %v811_v44 = vadd.f32 %v810_v18, %v796_v42 }
 0x284   :  { %v775_v43 = vadd.f32 %v774_v63, %v1881_v12  ;;  %v812_v20 = vadd.f32 %v811_v44, %v797_v15 }
 0x286   :  { %v776_v34 = vadd.f32 %v775_v43, %v1883_v21  ;;  %v813_v53 = vadd.f32 %v812_v20, %v798_v48 }
 0x288   :  { %v777_v49 = vadd.f32 %v776_v34, %v1885_v22  ;;  %v814_v56 = vadd.f32 %v813_v53, %v799_v52 }
 0x28a   :  { %v778_v54 = vadd.f32 %v777_v49, %v1887_v23  ;;  %v815_v59 = vadd.f32 %v814_v56, %v800_v55 }
 0x28c   :  { %v779_v57 = vadd.f32 %v778_v54, %v1889_v25  ;;  %v816_v0 = vadd.f32 %v815_v59, %v801_v58 }
 0x28e   :  { %v780_v60 = vadd.f32 %v779_v57, %v1891_v26  ;;  %v817_v7 = vadd.f32 %v816_v0, %v802_v62  ;;  %v1056_v0 = vld [vmem:[%s2018_s6] ss:$0 sm:$0xff] }
 0x290   :  { %v781_v1 = vadd.f32 %v780_v60, %v1893_v27  ;;  %v818_v10 = vadd.f32 %v817_v7, %v803_v6 }
 0x292   :  { %v782_v8 = vadd.f32 %v781_v1, %v1865_v40  ;;  %v819_v3 = vadd.f32 %v818_v10, %v804_v9 }
 0x294   :  { %v783_v32 = vadd.f32 %v782_v8, %v1895_v29  ;;  %v820_v11 = vadd.f32 %v819_v3, %v805_v51 }
 0x296   :  { %v784_v61 = vrot.slane %v783_v32, 4  ;;  %v821_v19 = vadd.f32 %v820_v11, %v806_v24 }
 0x298   :  { %v785_v13 = vadd.f32 %v784_v61, %v783_v32  ;;  %v822_v31 = vrot.slane %v821_v19, 4 }
 0x29a   :  { %v786_v30 = vrot.slane %v785_v13, 2  ;;  %v823_v36 = vadd.f32 %v822_v31, %v821_v19 }
 0x29c   :  { %v787_v35 = vadd.f32 %v786_v30, %v785_v13  ;;  %v824_v38 = vrot.slane %v823_v36, 2 }
 0x29e   :  { %v788_v37 = vrot.slane %v787_v35, 1  ;;  %v825_v14 = vadd.f32 %v824_v38, %v823_v36 }
 0x2a0   :  { %v789_v17 = vadd.f32 %v788_v37, %v787_v35  ;;  %v826_v50 = vrot.slane %v825_v14, 1 }
 0x2a2   :  { %v790_v28 = vmul.f32 0.0078125, %v789_v17  ;;  %v827_v39 = vadd.f32 %v826_v50, %v825_v14 }
 0x2a4   :  { %v829_v45 = vmul.f32 %v790_v28, %v790_v28  ;;  %v832_v4 = vsub.f32 %v1867_v33, %v790_v28  ;;  %v846_v63 = vsub.f32 %v1865_v40, %v790_v28  ;;  %v833_v42 = vsub.f32 %v1869_v41, %v790_v28 }
 0x2a5   :  { %v847_v18 = vsub.f32 %v1895_v29, %v790_v28  ;;  %v834_v43 = vsub.f32 %v1871_v47, %v790_v28  ;;  %v835_v15 = vsub.f32 %v1873_v5, %v790_v28  ;;  %v828_v44 = vmul.f32 0.0078125, %v827_v39 }
 0x2a6   :  { %v836_v34 = vsub.f32 %v1875_v2, %v790_v28  ;;  %v837_v48 = vsub.f32 %v1877_v46, %v790_v28  ;;  %v838_v20 = vsub.f32 %v1879_v16, %v790_v28  ;;  %v839_v49 = vsub.f32 %v1881_v12, %v790_v28 }
 0x2a7   :  { %v840_v33 = vsub.f32 %v1883_v21, %v790_v28  ;;  %v841_v40 = vsub.f32 %v1885_v22, %v790_v28  ;;  %v842_v41 = vsub.f32 %v1887_v23, %v790_v28  ;;  %v830_v29 = vsub.f32 %v828_v44, %v829_v45 }
 0x2a8   :  { %v843_v47 = vsub.f32 %v1889_v25, %v790_v28  ;;  %v844_v5 = vsub.f32 %v1891_v26, %v790_v28  ;;  %v845_v52 = vsub.f32 %v1893_v27, %v790_v28 }
 0x2a9   :  { %v831_v2 = vmax.f32 %v830_v29, 0.0 }
 0x2ab   :  { %v848_v53 = vadd.f32 1e-05, %v831_v2 }
 0x2ad   :  { %1444 = vrsqrt.f32 %v848_v53 }
 0x2b7   :  { %v1445_v46 = vpop.eup %1444 }
 0x2b8   :  { %v850_v16 = vmul.f32 %v1445_v46, %v832_v4  ;;  %v864_v54 = vmul.f32 %v1445_v46, %v846_v63  ;;  %v851_v12 = vmul.f32 %v1445_v46, %v833_v42  ;;  %v865_v55 = vmul.f32 %v1445_v46, %v847_v18 }
 0x2b9   :  { %v852_v21 = vmul.f32 %v1445_v46, %v834_v43  ;;  %v853_v56 = vmul.f32 %v1445_v46, %v835_v15  ;;  %v854_v22 = vmul.f32 %v1445_v46, %v836_v34  ;;  %v855_v57 = vmul.f32 %v1445_v46, %v837_v48 }
 0x2ba   :  { %1261 = vmatprep.mubr.f32.mxu0 %v850_v16  ;;  %1282 = vmatprep.mubr.f32.mxu1 %v864_v54  ;;  %v856_v23 = vmul.f32 %v1445_v46, %v838_v20  ;;  %v857_v25 = vmul.f32 %v1445_v46, %v839_v49  ;;  %v858_v58 = vmul.f32 %v1445_v46, %v840_v33 }
 0x2bb   :  { %1262 = vmatmul.mubr.f32.vlgmr.msra.gmra.mrb[16].mxu0 %v851_v12  ;;  %1283 = vmatmul.mubr.f32.vlgmr.msra.gmra.mrb[16].mxu1 %v865_v55  ;;  %v859_v26 = vmul.f32 %v1445_v46, %v841_v40  ;;  %v860_v27 = vmul.f32 %v1445_v46, %v842_v41  ;;  %v861_v59 = vmul.f32 %v1445_v46, %v843_v47 }
 0x2bc   :  { %1264 = vmatprep.mubr.f32.mxu0 %v852_v21  ;;  %v862_v60 = vmul.f32 %v1445_v46, %v844_v5  ;;  %v863_v62 = vmul.f32 %v1445_v46, %v845_v52 }
 0x2bf   :  { %1265 = vmatmul.mubr.f32.gmra.mrb[18].mxu0 %v853_v56 }
 0x2c0   :  { %1267 = vmatprep.mubr.f32.mxu0 %v854_v22 }
 0x2c3   :  { %1268 = vmatmul.mubr.f32.gmra.mrb[20].mxu0 %v855_v57 }
 0x2c4   :  { %1270 = vmatprep.mubr.f32.mxu0 %v856_v23 }
 0x2c7   :  { %1271 = vmatmul.mubr.f32.gmra.mrb[22].mxu0 %v857_v25 }
 0x2c8   :  { %1273 = vmatprep.mubr.f32.mxu0 %v858_v58 }
 0x2cb   :  { %1274 = vmatmul.mubr.f32.gmra.mrb[24].mxu0 %v859_v26 }
 0x2cc   :  { %1276 = vmatprep.mubr.f32.mxu0 %v860_v27 }
 0x2cf   :  { %1277 = vmatmul.mubr.f32.gmra.mrb[26].mxu0 %v861_v59 }
 0x2d0   :  { %1279 = vmatprep.mubr.f32.mxu0 %v862_v60 }
 0x2d3   :  { %1280 = vmatmul.mubr.f32.gmra.mrb[28].mxu0 %v863_v62 }
 0x38e   :  { %v1263_v1 = vpop.f32.mrb[16].mxu0  ;;  %v1284_v6 = vpop.f32.mrb[16].mxu1 }
 0x38f   :  { %v944_v7 = vadd.f32 %v1263_v1, %v1056_v0  ;;  %v1014_v8 = vadd.f32 %v1284_v6, %v1056_v0  ;;  %v938_v9 = vpop.f32.mrb[17].mxu0  ;;  %v1008_v10 = vpop.f32.mrb[17].mxu1 }
 0x390   :  { %v939_v51 = vadd.f32 %v1056_v0, %v938_v9  ;;  %v1009_v32 = vadd.f32 %v1056_v0, %v1008_v10 }
 0x391   :  { %1018 = vst [vmem:[%s2019_s7 + $0x8] sm:$0xff] %v944_v7  ;;  %1032 = vst [vmem:[%s2019_s7 + $0x78] sm:$0xff] %v1014_v8 }
 0x392   :  { %1017 = vst [vmem:[%s2019_s7] sm:$0xff] %v939_v51  ;;  %1031 = vst [vmem:[%s2019_s7 + $0x70] sm:$0xff] %v1009_v32  ;;  %v1266_v3 = vpop.f32.mrb[18].mxu0 }
 0x393   :  { %v954_v61 = vadd.f32 %v1266_v3, %v1056_v0  ;;  %v948_v24 = vpop.f32.mrb[19].mxu0 }
 0x394   :  { %v949_v11 = vadd.f32 %v1056_v0, %v948_v24 }
 0x395   :  { %1020 = vst [vmem:[%s2019_s7 + $0x18] sm:$0xff] %v954_v61 }
 0x396   :  { %1019 = vst [vmem:[%s2019_s7 + $0x10] sm:$0xff] %v949_v11  ;;  %v1269_v13 = vpop.f32.mrb[20].mxu0 }
 0x397   :  { %v964_v19 = vadd.f32 %v1269_v13, %v1056_v0  ;;  %v958_v30 = vpop.f32.mrb[21].mxu0 }
 0x398   :  { %v959_v31 = vadd.f32 %v1056_v0, %v958_v30 }
 0x399   :  { %1022 = vst [vmem:[%s2019_s7 + $0x28] sm:$0xff] %v964_v19 }
 0x39a   :  { %1021 = vst [vmem:[%s2019_s7 + $0x20] sm:$0xff] %v959_v31  ;;  %v1272_v35 = vpop.f32.mrb[22].mxu0 }
 0x39b   :  { %v974_v36 = vadd.f32 %v1272_v35, %v1056_v0  ;;  %v968_v37 = vpop.f32.mrb[23].mxu0 }
 0x39c   :  { %v969_v38 = vadd.f32 %v1056_v0, %v968_v37 }
 0x39d   :  { %1024 = vst [vmem:[%s2019_s7 + $0x38] sm:$0xff] %v974_v36 }
 0x39e   :  { %1023 = vst [vmem:[%s2019_s7 + $0x30] sm:$0xff] %v969_v38  ;;  %v1275_v17 = vpop.f32.mrb[24].mxu0 }
 0x39f   :  { %v984_v14 = vadd.f32 %v1275_v17, %v1056_v0  ;;  %v978_v28 = vpop.f32.mrb[25].mxu0 }
 0x3a0   :  { %v979_v50 = vadd.f32 %v1056_v0, %v978_v28 }
 0x3a1   :  { %1026 = vst [vmem:[%s2019_s7 + $0x48] sm:$0xff] %v984_v14 }
 0x3a2   :  { %1025 = vst [vmem:[%s2019_s7 + $0x40] sm:$0xff] %v979_v50  ;;  %v1278_v39 = vpop.f32.mrb[26].mxu0 }
 0x3a3   :  { %v994_v45 = vadd.f32 %v1278_v39, %v1056_v0  ;;  %v988_v4 = vpop.f32.mrb[27].mxu0 }
 0x3a4   :  { %v989_v63 = vadd.f32 %v1056_v0, %v988_v4 }
 0x3a5   :  { %1028 = vst [vmem:[%s2019_s7 + $0x58] sm:$0xff] %v994_v45 }
 0x3a6   :  { %1027 = vst [vmem:[%s2019_s7 + $0x50] sm:$0xff] %v989_v63  ;;  %v1281_v42 = vpop.f32.mrb[28].mxu0 }
 0x3a7   :  { %v1004_v18 = vadd.f32 %v1281_v42, %v1056_v0  ;;  %v998_v43 = vpop.f32.mrb[29].mxu0 }
 0x3a8   :  { %v999_v15 = vadd.f32 %v1056_v0, %v998_v43 }
 0x3a9   :  { %1030 = vst [vmem:[%s2019_s7 + $0x68] sm:$0xff] %v1004_v18 }
 0x3aa   :  { %1029 = vst [vmem:[%s2019_s7 + $0x60] sm:$0xff] %v999_v15 }
 0x3ab   :  { %1037 = vsyncpa [#allocation3], 1 }

</bundles_post_ra>
